<compile_context>
chip_gen: v7x
topology: tpu7x:2x2x1
jax: 0.10.0
libtpu: 0.0.40
codegen_flags: <defaults>
</compile_context>

<pallas_src>
import jax
import jax.numpy as jnp
from jax.experimental import pallas as pl
from jax.experimental.pallas import tpu as pltpu

LANE = 128
IN_DIM, H1, H2, OUT_DIM = 784, 300, 100, 10
H1P, H2P, OUT_PAD = 384, 128, 128   # lane/sublane-aligned padded widths


def _round_up(n, m):
    return ((n + m - 1) // m) * m


def mlp_kernel(x_ref, w1_ref, b1_ref, w2_ref, b2_ref, w3_ref, b3_ref, out_ref):
    # x tile: (TB, 784) f32 (read once from HBM, cast in-kernel); weights bf16;
    # biases f32; out tile: (TB, 128) bf16.
    x = x_ref[...].astype(jnp.bfloat16)

    # fc1 + ReLU  (bf16 MXU operands, f32 accumulate / elementwise)
    h1 = jnp.dot(x, w1_ref[...], preferred_element_type=jnp.float32)
    h1 = jnp.maximum(h1 + b1_ref[...], 0.0)                        # (TB, 384) f32

    # fc2 + ReLU
    h2 = jnp.dot(h1.astype(jnp.bfloat16), w2_ref[...],
                 preferred_element_type=jnp.float32)
    h2 = jnp.maximum(h2 + b2_ref[...], 0.0)                        # (TB, 128) f32

    # fc3 (logits, no activation) -- columns padded to 128 lanes, stored bf16
    h3 = jnp.dot(h2.astype(jnp.bfloat16), w3_ref[...],
                 preferred_element_type=jnp.float32)
    out_ref[...] = (h3 + b3_ref[...]).astype(out_ref.dtype)        # (TB, 128) bf16


def prepare_params(params):
    """One-time weight prep: bf16 cast + zero-pad to MXU/lane-aligned widths.

    Padded W columns/rows are zero, so padded hidden units are exactly 0 after
    ReLU and padded logits are exactly 0 -> numerics of the real 10 logits are
    unchanged.
    """
    w1, b1, w2, b2, w3, b3 = params
    w1p = jnp.pad(w1.astype(jnp.bfloat16), ((0, 0), (0, H1P - H1)))
    b1p = jnp.pad(b1.reshape(1, H1).astype(jnp.float32), ((0, 0), (0, H1P - H1)))
    w2p = jnp.pad(w2.astype(jnp.bfloat16), ((0, H1P - H1), (0, H2P - H2)))
    b2p = jnp.pad(b2.reshape(1, H2).astype(jnp.float32), ((0, 0), (0, H2P - H2)))
    w3p = jnp.pad(w3.astype(jnp.bfloat16), ((0, H2P - H2), (0, OUT_PAD - OUT_DIM)))
    b3p = jnp.pad(b3.reshape(1, OUT_DIM).astype(jnp.float32),
                  ((0, 0), (0, OUT_PAD - OUT_DIM)))
    return (w1p, b1p, w2p, b2p, w3p, b3p)


def mnist_classifier_forward(x, prepared_params, *, tile_batch=2048):
    """x: any shape whose trailing dims flatten to 784 (e.g. (B, 1, 28, 28)).

    prepared_params: output of prepare_params() (padded bf16 weights, f32 biases).
    Returns (batch, 10) f32 logits.
    """
    w1, b1, w2, b2, w3, b3 = prepared_params

    x2d = x.reshape(-1, IN_DIM)            # free reshape; dtype unchanged
    batch = x2d.shape[0]
    x_bytes = jnp.dtype(x2d.dtype).itemsize

    # Batch tile: multiple of 16 (bf16 sublane packing).
    tb = min(_round_up(tile_batch, 16), _round_up(batch, 16))
    # If a large batch would otherwise be a single grid step, split it in two
    # (>=512 rows each) so the megacore-parallel axis feeds both v7x cores.
    if _round_up(batch, 16) <= tb and batch >= 1024:
        tb = max(512, _round_up((batch + 1) // 2, 16))
    n_tiles = pl.cdiv(batch, tb)           # ragged trailing block handled by Pallas

    # VMEM budget from the real padded layouts (double-buffered x/out tiles,
    # resident weights/biases, in-kernel f32/bf16 temporaries) + 1.5x headroom.
    vmem_est = (
        2 * tb * IN_DIM * x_bytes                              # x tiles
        + 2 * tb * OUT_PAD * 2                                 # bf16 out tiles
        + 2 * 2 * (IN_DIM * H1P + H1P * H2P + H2P * OUT_PAD)   # bf16 weights
        + 2 * 4 * (H1P + H2P + OUT_PAD)                        # f32 biases
        + tb * (IN_DIM * 2 + H1P * 6 + H2P * 6 + OUT_PAD * 4)  # temporaries
    )
    try:
        phys_vmem = int(pltpu.get_tpu_info().vmem_capacity_bytes)
    except Exception:
        phys_vmem = 64 * 1024 * 1024        # conservative (v7x per-TC size)
    vmem_cap = (phys_vmem * 5) // 8         # <=40 MiB on v7x, <=80 MiB on v5e/v6e
    vmem_limit = int(min(max(vmem_est + vmem_est // 2, 8 * 1024 * 1024), vmem_cap))

    flops = 2 * batch * (IN_DIM * H1P + H1P * H2P + H2P * OUT_PAD)
    bytes_accessed = (
        batch * IN_DIM * x_bytes
        + 2 * (IN_DIM * H1P + H1P * H2P + H2P * OUT_PAD)
        + 4 * (H1P + H2P + OUT_PAD)
        + batch * OUT_PAD * 2
    )

    const = lambda i: (0, 0)  # weights/biases: same block every step (resident)

    out_padded = pl.pallas_call(
        mlp_kernel,
        out_shape=jax.ShapeDtypeStruct((batch, OUT_PAD), jnp.bfloat16),
        grid=(n_tiles,),
        in_specs=[
            pl.BlockSpec((tb, IN_DIM), lambda i: (i, 0)),      # x: tiled on batch
            pl.BlockSpec((IN_DIM, H1P), const),                # w1
            pl.BlockSpec((1, H1P), const),                     # b1
            pl.BlockSpec((H1P, H2P), const),                   # w2
            pl.BlockSpec((1, H2P), const),                     # b2
            pl.BlockSpec((H2P, OUT_PAD), const),               # w3
            pl.BlockSpec((1, OUT_PAD), const),                 # b3
        ],
        out_specs=pl.BlockSpec((tb, OUT_PAD), lambda i: (i, 0)),
        compiler_params=pltpu.CompilerParams(
            dimension_semantics=("parallel",),                 # megacore on v7x
            vmem_limit_bytes=vmem_limit,
        ),
        cost_estimate=pl.CostEstimate(
            flops=int(flops), transcendentals=0, bytes_accessed=int(bytes_accessed)),
    )(x2d, w1, b1, w2, b2, w3, b3)

    # Keep this slice adjacent to the call: only columns [:10] are real logits.
    return out_padded[:, :OUT_DIM].astype(jnp.float32)


def init_params(key):
    """Deterministic init mimicking nn.Linear's uniform(-1/sqrt(fan_in), +).

    Weights are stored as (in, out) so the kernel computes x @ W directly.
    """
    def linear(key, fan_in, fan_out):
        kw, kb = jax.random.split(key)
        bound = 1.0 / jnp.sqrt(fan_in)
        w = jax.random.uniform(kw, (fan_in, fan_out), jnp.float32, -bound, bound)
        b = jax.random.uniform(kb, (1, fan_out), jnp.float32, -bound, bound)
        return w, b

    k1, k2, k3 = jax.random.split(key, 3)
    w1, b1 = linear(k1, IN_DIM, H1)
    w2, b2 = linear(k2, H1, H2)
    w3, b3 = linear(k3, H2, OUT_DIM)
    return (w1, b1, w2, b2, w3, b3)


if __name__ == "__main__":
    key = jax.random.PRNGKey(0)
    k_params, k_x = jax.random.split(key)

    params = init_params(k_params)
    prepared = prepare_params(params)   # one-time padded/bf16 weight prep

    # Small MNIST-shaped batch: batch=40 with tile_batch=16 exercises the
    # multi-step grid AND the ragged trailing block (rows 40..47 of the last
    # tile are out-of-bounds -> their writes are dropped, no wrapper padding).
    x = jax.random.normal(k_x, (40, 1, 28, 28), dtype=jnp.float32)

    out = mnist_classifier_forward(x, prepared, tile_batch=16)
    out = jax.block_until_ready(out)

    # Reference in plain JAX with the same bf16-operand / f32-accumulate recipe
    # (and bf16-rounded logits to match the kernel's bf16 writeback).
    w1, b1, w2, b2, w3, b3 = params
    x2d = x.reshape(-1, IN_DIM)

    def bf16_dot(a, w):
        return jnp.dot(a.astype(jnp.bfloat16), w.astype(jnp.bfloat16),
                       preferred_element_type=jnp.float32)

    ref = jnp.maximum(bf16_dot(x2d, w1) + b1, 0.0)
    ref = jnp.maximum(bf16_dot(ref, w2) + b2, 0.0)
    ref = bf16_dot(ref, w3) + b3
    ref = ref.astype(jnp.bfloat16).astype(jnp.float32)

    assert out.shape == (40, OUT_DIM)
    assert out.dtype == jnp.float32
    assert jnp.allclose(out, ref, atol=5e-2, rtol=5e-2), float(
        jnp.max(jnp.abs(out - ref)))

    print("KERNEL_OK")
</pallas_src>

<mosaic_0001>
module attributes {stable_mosaic.version = 11 : i64} {
  func.func @mlp_kernel(%arg0: i32, %arg1: memref<16x784xf32, #tpu.memory_space<vmem>>, %arg2: memref<784x384xbf16, #tpu.memory_space<vmem>>, %arg3: memref<1x384xf32, #tpu.memory_space<vmem>>, %arg4: memref<384x128xbf16, #tpu.memory_space<vmem>>, %arg5: memref<1x128xf32, #tpu.memory_space<vmem>>, %arg6: memref<128x128xbf16, #tpu.memory_space<vmem>>, %arg7: memref<1x128xf32, #tpu.memory_space<vmem>>, %arg8: memref<16x128xbf16, #tpu.memory_space<vmem>>) attributes {dimension_semantics = [#tpu.dimension_semantics<parallel>], iteration_bounds = array<i64: 3>, scalar_prefetch = 0 : i64, scratch_operands = 0 : i64, tpu.core_type = #tpu.core_type<tc>, window_params = [{transform_indices = @transform_0, window_bounds = array<i64: 16, 784>}, {pipeline_mode = #tpu.pipeline_mode<synchronous>, transform_indices = @transform_1, window_bounds = array<i64: 784, 384>}, {pipeline_mode = #tpu.pipeline_mode<synchronous>, transform_indices = @transform_2, window_bounds = array<i64: 1, 384>}, {pipeline_mode = #tpu.pipeline_mode<synchronous>, transform_indices = @transform_3, window_bounds = array<i64: 384, 128>}, {pipeline_mode = #tpu.pipeline_mode<synchronous>, transform_indices = @transform_4, window_bounds = array<i64: 1, 128>}, {pipeline_mode = #tpu.pipeline_mode<synchronous>, transform_indices = @transform_5, window_bounds = array<i64: 128, 128>}, {pipeline_mode = #tpu.pipeline_mode<synchronous>, transform_indices = @transform_6, window_bounds = array<i64: 1, 128>}, {transform_indices = @transform_7, window_bounds = array<i64: 16, 128>}]} {
    %c0 = arith.constant 0 : index
    %c0_0 = arith.constant 0 : index
    %0 = vector.load %arg1[%c0, %c0_0] : memref<16x784xf32, #tpu.memory_space<vmem>>, vector<16x784xf32>
    %1 = arith.truncf %0 : vector<16x784xf32> to vector<16x784xbf16>
    %c0_1 = arith.constant 0 : index
    %c0_2 = arith.constant 0 : index
    %2 = vector.load %arg2[%c0_1, %c0_2] : memref<784x384xbf16, #tpu.memory_space<vmem>>, vector<784x384xbf16>
    %cst = arith.constant dense<0.000000e+00> : vector<16x384xf32>
    %3 = tpu.matmul %1, %2, %cst {dimension_numbers = #tpu.dot_dimension_numbers<[1], [0], [0], [1], [0, 0, 1, 1], [], []>} : vector<16x784xbf16>, vector<784x384xbf16>, vector<16x384xf32> -> vector<16x384xf32>
    %c0_3 = arith.constant 0 : index
    %c0_4 = arith.constant 0 : index
    %4 = vector.load %arg3[%c0_3, %c0_4] : memref<1x384xf32, #tpu.memory_space<vmem>>, vector<1x384xf32>
    %5 = vector.broadcast %4 : vector<1x384xf32> to vector<16x384xf32>
    %6 = arith.addf %3, %5 : vector<16x384xf32>
    %cst_5 = arith.constant 0.000000e+00 : f32
    %7 = vector.broadcast %cst_5 : f32 to vector<16x384xf32>
    %8 = arith.maximumf %6, %7 : vector<16x384xf32>
    %9 = arith.truncf %8 : vector<16x384xf32> to vector<16x384xbf16>
    %c0_6 = arith.constant 0 : index
    %c0_7 = arith.constant 0 : index
    %10 = vector.load %arg4[%c0_6, %c0_7] : memref<384x128xbf16, #tpu.memory_space<vmem>>, vector<384x128xbf16>
    %cst_8 = arith.constant dense<0.000000e+00> : vector<16x128xf32>
    %11 = tpu.matmul %9, %10, %cst_8 {dimension_numbers = #tpu.dot_dimension_numbers<[1], [0], [0], [1], [0, 0, 1, 1], [], []>} : vector<16x384xbf16>, vector<384x128xbf16>, vector<16x128xf32> -> vector<16x128xf32>
    %c0_9 = arith.constant 0 : index
    %c0_10 = arith.constant 0 : index
    %12 = vector.load %arg5[%c0_9, %c0_10] : memref<1x128xf32, #tpu.memory_space<vmem>>, vector<1x128xf32>
    %13 = vector.broadcast %12 : vector<1x128xf32> to vector<16x128xf32>
    %14 = arith.addf %11, %13 : vector<16x128xf32>
    %cst_11 = arith.constant 0.000000e+00 : f32
    %15 = vector.broadcast %cst_11 : f32 to vector<16x128xf32>
    %16 = arith.maximumf %14, %15 : vector<16x128xf32>
    %17 = arith.truncf %16 : vector<16x128xf32> to vector<16x128xbf16>
    %c0_12 = arith.constant 0 : index
    %c0_13 = arith.constant 0 : index
    %18 = vector.load %arg6[%c0_12, %c0_13] : memref<128x128xbf16, #tpu.memory_space<vmem>>, vector<128x128xbf16>
    %cst_14 = arith.constant dense<0.000000e+00> : vector<16x128xf32>
    %19 = tpu.matmul %17, %18, %cst_14 {dimension_numbers = #tpu.dot_dimension_numbers<[1], [0], [0], [1], [0, 0, 1, 1], [], []>} : vector<16x128xbf16>, vector<128x128xbf16>, vector<16x128xf32> -> vector<16x128xf32>
    %c0_15 = arith.constant 0 : index
    %c0_16 = arith.constant 0 : index
    %20 = vector.load %arg7[%c0_15, %c0_16] : memref<1x128xf32, #tpu.memory_space<vmem>>, vector<1x128xf32>
    %21 = vector.broadcast %20 : vector<1x128xf32> to vector<16x128xf32>
    %22 = arith.addf %19, %21 : vector<16x128xf32>
    %23 = arith.truncf %22 : vector<16x128xf32> to vector<16x128xbf16>
    %c0_17 = arith.constant 0 : index
    %c0_18 = arith.constant 0 : index
    %24 = vector.load %arg8[%c0_17, %c0_18] : memref<16x128xbf16, #tpu.memory_space<vmem>>, vector<16x128xbf16>
    tpu.vector_store %arg8[%c0_17, %c0_18], %23 {strides = array<i32>} : memref<16x128xbf16, #tpu.memory_space<vmem>>, vector<16x128xbf16>,
    return
  }
  func.func @transform_0(%arg0: i32) -> (i32, i32) {
    %c0_i32 = arith.constant 0 : i32
    %c0_i32_0 = arith.constant 0 : i32
    return %arg0, %c0_i32 : i32, i32
  }
  func.func @transform_1(%arg0: i32) -> (i32, i32) {
    %c0_i32 = arith.constant 0 : i32
    %c0_i32_0 = arith.constant 0 : i32
    %c0_i32_1 = arith.constant 0 : i32
    return %c0_i32, %c0_i32_0 : i32, i32
  }
  func.func @transform_2(%arg0: i32) -> (i32, i32) {
    %c0_i32 = arith.constant 0 : i32
    %c0_i32_0 = arith.constant 0 : i32
    %c0_i32_1 = arith.constant 0 : i32
    return %c0_i32, %c0_i32_0 : i32, i32
  }
  func.func @transform_3(%arg0: i32) -> (i32, i32) {
    %c0_i32 = arith.constant 0 : i32
    %c0_i32_0 = arith.constant 0 : i32
    %c0_i32_1 = arith.constant 0 : i32
    return %c0_i32, %c0_i32_0 : i32, i32
  }
  func.func @transform_4(%arg0: i32) -> (i32, i32) {
    %c0_i32 = arith.constant 0 : i32
    %c0_i32_0 = arith.constant 0 : i32
    %c0_i32_1 = arith.constant 0 : i32
    return %c0_i32, %c0_i32_0 : i32, i32
  }
  func.func @transform_5(%arg0: i32) -> (i32, i32) {
    %c0_i32 = arith.constant 0 : i32
    %c0_i32_0 = arith.constant 0 : i32
    %c0_i32_1 = arith.constant 0 : i32
    return %c0_i32, %c0_i32_0 : i32, i32
  }
  func.func @transform_6(%arg0: i32) -> (i32, i32) {
    %c0_i32 = arith.constant 0 : i32
    %c0_i32_0 = arith.constant 0 : i32
    %c0_i32_1 = arith.constant 0 : i32
    return %c0_i32, %c0_i32_0 : i32, i32
  }
  func.func @transform_7(%arg0: i32) -> (i32, i32) {
    %c0_i32 = arith.constant 0 : i32
    %c0_i32_0 = arith.constant 0 : i32
    return %arg0, %c0_i32 : i32, i32
  }
}

</mosaic_0001>

<bundles_post_ra>
// kernel: tpu_custom_call.1
= control target key start
LH: loop header
LB: loop body
LE: loop exit
PB: predicated region body
PF: predicated region fallthrough
CT: control target
= control target key end

     0   :  { %s3529_s0 = inlined_call_operand.hbm [shape: f32[40,784], index: 0, kind: input, shape index: {}]   ;;  %s3530_s1 = inlined_call_operand.hbm [shape: bf16[784,384], index: 1, kind: input, shape index: {}]   ;;  %s3531_s2 = inlined_call_operand.vmem [shape: f32[1,384], index: 2, kind: input, shape index: {}]   ;;  %s3532_s3 = inlined_call_operand.hbm [shape: bf16[384,128], index: 3, kind: input, shape index: {}]   ;;  %s3533_s4 = inlined_call_operand.vmem [shape: f32[1,128], index: 4, kind: input, shape index: {}]   ;;  %s3534_s5 = inlined_call_operand.hbm [shape: bf16[128,128], index: 5, kind: input, shape index: {}]   ;;  %s3535_s6 = inlined_call_operand.vmem [shape: f32[1,128], index: 6, kind: input, shape index: {}]   ;;  %s3536_s7 = inlined_call_operand.hbm [shape: bf16[40,128], index: 7, kind: output, shape index: {}]  }
   0x1   :  { %3544 = sst [smem:[#allocation19_spill]] %s3530_s1 }
   0x2   :  { %12 = vsyncpa [#allocation3], 0 }
   0x3   :  { %14 = vsyncpa [#allocation3 + $0x1], 0 }
   0x4   :  { %15 = vsyncpa [#allocation6], 0 }
   0x5   :  { %16 = vsyncpa [#allocation9], 0 }
   0x6   :  { %17 = vsyncpa [#allocation4], 0 }
   0x7   :  { %19 = vsyncpa [#allocation4 + $0x1], 0  ;;  %s3202_s24 = smov 0   ;;  %s3204_s25 = smov 0  }
   0x8   :  { %s3206_s26 = smov 0   ;;  %s3208_s27 = smov 0  }
   0x9 LB: > { %3545 = sst [smem:[#allocation15_spill]] %s3132_s24  ;;  %s3223_s28 = sadd.s32 4294967295, %s3144_s27   ;;  %s3144_s27 = sphi %s3208_s27, %s3568_s27   ;;  %s3140_s26 = sphi %s3206_s26, %s3572_s26   ;;  %s3136_s25 = sphi %s3204_s25, %s3571_s25   ;;  %s3132_s24 = sphi %s3202_s24, %s3570_s24  }
   0xa   : > { %s2256_s29 = sadd.s32 4294967294, %s3144_s27   ;;  %s3227_s30 = sadd.s32 1, %s3144_s27  }
   0xb   : > { %3546 = sst [smem:[#allocation16_spill]] %s3227_s30  ;;  %s32_s8 = sadd.s32 1, %s3140_s26 }
   0xc   : > { %s29_s9 = ssub.s32 %s3144_s27, %s3227_s30  ;;  %p39_p0 = scmp.ne.s32.totalorder %s3140_s26, %s3136_s25 }
   0xd   : > { %p30_p1 = scmp.eq.s32.totalorder %s29_s9, 0  ;;  %p40_p2 = scmp.eq.s32.totalorder %s3144_s27, 0 }
   0xe   : > { %p45_p3 = scmp.ne.s32.totalorder %s3136_s25, %s3132_s24  ;;  %p3537_p4 = scmp.eq.s32.totalorder %s3223_s28, 0 }
   0xf   : > { %s3239_s10 = scalar_select %p30_p1, %s3140_s26, %s32_s8  }
  0x10   : > { %p3241_p5 = por %p40_p2, %p39_p0  ;;  %p3247_p6 = por %p3537_p4, %p45_p3 }
  0x11   : > { %3547 = sst [smem:[#allocation17_spill]] %s3239_s10  ;;  %p195_p7 = scmp.eq.s32.totalorder %s3223_s28, 2 }
  0x12   : > { %s3548_s11 = scalar_select %p3241_p5, 1, 0 }
  0x13   : > { %s3549_s12 = scalar_select %p3247_p6, 1, 0 }
  0x14   : > { %p201_p8 = scmp.eq.s32.totalorder %s2256_s29, 2  ;;  %p2257_p9 = scmp.ge.s32.totalorder %s3144_s27, 1 }
  0x15   : > { %p208_p10 = scmp.lt.s32.totalorder %s3144_s27, 4  ;;  %p3254_p11 = por %p195_p7, %p39_p0 }
  0x16   : > { %p3258_p12 = por %p201_p8, %p45_p3  ;;  %s3146_s16 = smov [#allocation5]  }
  0x17   : > { %s3550_s13 = scalar_select %p3254_p11, 1, 0 }
  0x18   : > { %s3551_s14 = scalar_select %p3258_p12, 1, 0 }
  0x19   : > { %p3262_p13 = pnand %p2257_p9, %p208_p10  ;;  %s220_s17 = sshll.u32 %s3146_s16, 4  ;;  %s221_s17 = int_to_ptr.vmem [resolvable:$true] %s220_s17 }
  0x1a   : > { %3552 = sst [smem:[#allocation18_spill]] %s3551_s14  ;;  %s3147_s19 = smov [#allocation7]  }
  0x1b   : > { %s3553_s15 = scalar_select %p3262_p13, 1, 0 }
  0x1c   : > { %p2663_p1 = pneg %p3262_p13  ;;  %s236_s20 = sshll.u32 %s3147_s19, 4  ;;  %s3274_s20 = int_to_ptr.vmem [resolvable:$true] %s236_s20 }
  0x1d   : > { %s3555_s1 = sld [smem:[#allocation19_spill]] }
  0x1e   : > { %p3270_p2 = pnand %p2663_p1, %p3537_p4 }
  0x20   : > { %p3284_p3 = pneg %p3270_p2 }
  0x23   : > { %s2958_s23 = scalar_lea.hbm %s3555_s1, 18816 }
  0x24   : > { %p2959_p0 = scmp.ne.s32.totalorder %s3555_s1, %s2958_s23  ;;  %p2965_p9 = scmp.lt.u32.totalorder %s2958_s23, %s3555_s1 }
  0x26   : > { %p2961_p7 = pnand %p3284_p3, %p2959_p0 }
  0x28   : > { %p2962_p8 = pneg %p2961_p7 }
  0x2a   : > { %p2967_p10 = pnand %p2965_p9, %p2962_p8 }
  0x2c   : > { %2970 = shalt.err (!%p2967_p10)
}
  0x2d   : > { %s2971_s21 = scalar_lea.vmem %s221_s17, 18816  ;;  %p2979_p11 = scmp.lt.s32.totalorder %s221_s17, %s221_s17 }
  0x2e   : > { %p2972_p1 = scmp.ne.s32.totalorder %s221_s17, %s2971_s21  ;;  %p2980_p6 = scmp.lt.s32.totalorder %s2971_s21, %s2971_s21 }
  0x30   : > { %p2974_p4 = pnand %p2972_p1, %p3284_p3  ;;  %p2981_p13 = por %p2980_p6, %p2979_p11 }
  0x32   : > { %p2975_p12 = pneg %p2974_p4 }
  0x34   : > { %p2982_p5 = pnand %p2981_p13, %p2975_p12 }
  0x36   : > { %2985 = shalt.err (!%p2982_p5)
}
  0x37   : > { %s3148_s22 = smov 192   ;;  %s3149_s29 = smov 12  }
  0x38   : > { %2666 = dma.hbm_to_vmem [thread:$0]  (!%p3270_p2), %s3555_s1, 18816, %s221_s17, [#allocation6], %s3148_s22, %s3148_s22, %s3149_s29  }
  0x39   : > { %s2986_s10 = scalar_lea.hbm %s3532_s3, 3072 }
  0x3a   : > { %p2987_p4 = scmp.ne.s32.totalorder %s3532_s3, %s2986_s10  ;;  %p2993_p11 = scmp.lt.u32.totalorder %s2986_s10, %s3532_s3 }
  0x3c   : > { %p2989_p6 = pnand %p2987_p4, %p3284_p3 }
  0x3e   : > { %p2990_p5 = pneg %p2989_p6 }
  0x40   : > { %p2995_p12 = pnand %p2993_p11, %p2990_p5 }
  0x42   : > { %2998 = shalt.err (!%p2995_p12)
}
  0x43   : > { %s2999_s17 = scalar_lea.vmem %s3274_s20, 3072  ;;  %p3007_p8 = scmp.lt.s32.totalorder %s3274_s20, %s3274_s20 }
  0x44   : > { %p3000_p13 = scmp.ne.s32.totalorder %s3274_s20, %s2999_s17  ;;  %p3008_p9 = scmp.lt.s32.totalorder %s2999_s17, %s2999_s17 }
  0x46   : > { %p3002_p0 = pnand %p3000_p13, %p3284_p3  ;;  %p3009_p10 = por %p3008_p9, %p3007_p8 }
  0x48   : > { %p3003_p7 = pneg %p3002_p0 }
  0x4a   : > { %p3010_p1 = pnand %p3009_p10, %p3003_p7 }
  0x4c   : > { %3013 = shalt.err (!%p3010_p1)
}
  0x4d   : > { %s3150_s30 = smov 64   ;;  %s3151_s24 = smov 4  }
  0x4e   : > { %2669 = dma.hbm_to_vmem [thread:$0]  (!%p3270_p2), %s3532_s3, 3072, %s3274_s20, [#allocation6], %s3150_s30, %s3150_s30, %s3151_s24  }
  0x4f   : > { %s3152_s22 = smov [#allocation8]   ;;  %s3014_s16 = scalar_lea.hbm %s3534_s5, 1024 }
  0x50   : > { %s252_s29 = sshll.u32 %s3152_s22, 4  ;;  %p3015_p4 = scmp.ne.s32.totalorder %s3534_s5, %s3014_s16  ;;  %s253_s29 = int_to_ptr.vmem [resolvable:$true] %s252_s29 }
  0x51   : > { %p3021_p11 = scmp.lt.u32.totalorder %s3014_s16, %s3534_s5 }
  0x52   : > { %p3017_p6 = pnand %p3015_p4, %p3284_p3 }
  0x54   : > { %p3018_p5 = pneg %p3017_p6 }
  0x56   : > { %p3023_p12 = pnand %p3021_p11, %p3018_p5 }
  0x58   : > { %3026 = shalt.err (!%p3023_p12)
}
  0x59   : > { %s3027_s20 = scalar_lea.vmem %s253_s29, 1024  ;;  %p3035_p8 = scmp.lt.s32.totalorder %s253_s29, %s253_s29 }
  0x5a   : > { %p3028_p13 = scmp.ne.s32.totalorder %s253_s29, %s3027_s20  ;;  %p3036_p9 = scmp.lt.s32.totalorder %s3027_s20, %s3027_s20 }
  0x5c   : > { %p3030_p0 = pnand %p3028_p13, %p3284_p3  ;;  %p3037_p10 = por %p3036_p9, %p3035_p8 }
  0x5e   : > { %p3031_p7 = pneg %p3030_p0 }
  0x60   : > { %p3038_p1 = pnand %p3037_p10, %p3031_p7 }
  0x62   : > { %3041 = shalt.err (!%p3038_p1)
}
  0x63   : > { %2672 = dma.hbm_to_vmem [thread:$0]  (!%p3270_p2), %s3534_s5, 1024, %s253_s29, [#allocation9], %s3150_s30, %s3150_s30, %s3151_s24  }
  0x64   : > { %p2261_p4 = scmp.ge.s32.totalorder %s3144_s27, 3 }
  0x65   : > { %p3557_p6 = scmp.ne.s32.totalorder (!%p2261_p4), %s3548_s11, 0 }
  0x66   : > { %265 = sbr.rel (%p2261_p4) target bundleno = 145 (0x91), region = 40 }
  0x6d   : > { %268 = sbr.rel (!%p3557_p6) target bundleno = 145 (0x91), region = 44  ;;  %s269_s1 = sand.u32 (%p3557_p6), 1, %s3140_s26  }
  0x6e   : > { %s2262_s9 = sshll.u32 (%p3557_p6), %s3144_s27, 1  ;;  %s2646_s22 = smul.u32 (%p3557_p6), 112, %s269_s1 }
  0x6f   : > { %s275_s8 = ssub.s32 (%p3557_p6), 5, %s2262_s9  ;;  %s3349_s16 = scalar_lea.sflag (%p3557_p6), [#allocation3], %s269_s1 }
  0x70   : > { %p276_p3 = scmp.lt.s32.totalorder (%p3557_p6), %s275_s8, 2  ;;  %s273_s30 = scalar_lea.vmem (%p3557_p6), [#allocation2], %s2646_s22 }
  0x74   : > { %s3574_s8 = smov (!%p276_p3, %s275_s8), 2 }
  0x75   : > { %s3346_s23 = smul.u32 896, %s3574_s8 }
  0x77   : > { %s281_s18 = ssub.s32 1792, %s3346_s23 }
  0x78   : > { %282 = vsyncadd %s3349_s16, %s281_s18  ;;  %p2265_p2 = scmp.ne.s32.totalorder %s3346_s23, 0  ;;  %s2647_s11 = smul.u32 1792, %s3144_s27 }
  0x79   : > { %s288_s24 = sshll.u32 %s273_s30, 4  ;;  %s3046_s14 = scalar_lea.hbm %s3529_s0, 4480  ;;  %s3359_s24 = int_to_ptr.vmem [resolvable:$true] %s288_s24 }
  0x7a   : > { %s3357_s21 = scalar_lea.hbm %s3529_s0, %s2647_s11 }
  0x7b   : > { %s3042_s17 = scalar_lea.hbm %s3357_s21, %s3346_s23  ;;  %p3047_p13 = scmp.lt.u32.totalorder %s3357_s21, %s3529_s0 }
  0x7c   : > { %p3043_p5 = scmp.ne.s32.totalorder %s3357_s21, %s3042_s17  ;;  %p3048_p0 = scmp.lt.u32.totalorder %s3046_s14, %s3042_s17 }
  0x7d   : > { %p3050_p8 = scmp.lt.u32.totalorder %s3042_s17, %s3357_s21 }
  0x7e   : > { %p3044_p11 = pnand %p3043_p5, %p2265_p2  ;;  %p3049_p7 = por %p3048_p0, %p3047_p13 }
  0x80   : > { %p3045_p12 = pneg %p3044_p11  ;;  %p3051_p9 = por %p3050_p8, %p3049_p7 }
  0x82   : > { %p3052_p10 = pnand %p3051_p9, %p3045_p12 }
  0x84   : > { %3055 = shalt.err (!%p3052_p10)
}
  0x85   : > { %s3056_s22 = scalar_lea.vmem %s3359_s24, %s3346_s23  ;;  %s3153_s8 = smov [#allocation2]  }
  0x86   : > { %p3057_p1 = scmp.ne.s32.totalorder %s3359_s24, %s3056_s22  ;;  %s3060_s18 = sshll.u32 %s3153_s8, 4  ;;  %s3061_s18 = int_to_ptr.vmem [resolvable:$false] %s3060_s18 }
  0x87   : > { %s3062_s30 = scalar_lea.vmem %s3061_s18, 3584  ;;  %p3063_p3 = scmp.lt.s32.totalorder %s3359_s24, %s3061_s18 }
  0x88   : > { %p3058_p4 = pnand %p3057_p1, %p2265_p2  ;;  %p3064_p5 = scmp.lt.s32.totalorder %s3062_s30, %s3056_s22 }
  0x8a   : > { %p3059_p6 = pneg %p3058_p4  ;;  %p3065_p11 = por %p3064_p5, %p3063_p3 }
  0x8c   : > { %p3066_p13 = pnand %p3065_p11, %p3059_p6 }
  0x8e   : > { %3069 = shalt.err (!%p3066_p13)
}
  0x8f   : > { %s3154_s11 = smov 896   ;;  %s3155_s29 = smov 56  }
  0x90   : > { %294 = dma.hbm_to_vmem [thread:$0]  (%p2265_p2), %s3357_s21, %s3346_s23, %s3359_s24, %s3349_s16, %s3154_s11, %s3154_s11, %s3155_s29  }
  0x91 PF: > { %p3558_p12 = scmp.ne.s32.totalorder %s3553_s15, 0 }
  0x92   : > { %s3389_s19 = sand.u32 (!%p3558_p12), 1, %s3136_s25   ;;  %p3559_p0 = scmp.ne.s32.totalorder (!%p3558_p12), %s3549_s12, 0 }
  0x93   : > { %300 = sbr.rel (%p3558_p12) target bundleno = 1087 (0x43f), region = 48  ;;  %s303_s20 = scalar_lea.sflag (!%p3558_p12), [#allocation3], %s3389_s19 }
  0x94   : > { %s2648_s17 = smul.u32 (!%p3558_p12), 112, %s3389_s19 }
  0x96   : > { %s3393_s10 = scalar_lea.vmem (!%p3558_p12), [#allocation2], %s2648_s17 }
  0x9a   : > { %3115 = dma.done.wait (%p3559_p0), %s303_s20, 1792  }
  0x9b   : > { %3117 = vsyncadd (%p3559_p0), %s303_s20, 4294965504  ;;  %p3560_p2 = scmp.eq.s32.totalorder %s3223_s28, 0 }
  0x9d   : > { %3119 = dma.done.wait (%p3560_p2), [#allocation6], 21888   ;;  %p3561_p7 = pmov %p3560_p2 }
  0x9e   : > { %p3562_p8 = pmov %p3560_p2 }
  0x9f   : > { %3121 = vsyncadd (%p3561_p7), [#allocation6], 4294945408 }
  0xa0   : > { %3123 = dma.done.wait (%p3562_p8), [#allocation9], 1024   ;;  %p3563_p9 = pmov %p3560_p2 }
  0xa1   : > { %v2730_v0 = vld [vmem:[#allocation5 + $0x4] ss:$12 sps:$4 sm:$0xff]   ;;  %v2732_v1 = vld [vmem:[#allocation5] ss:$12 sps:$4 sm:$0xff]   ;;  %v2733_v2 = vld [vmem:[#allocation5 + $0x1c] ss:$12 sps:$4 sm:$0xff]  }
  0xa2   : > { %3125 = vsyncadd (%p3563_p9), [#allocation9], 4294966272  ;;  %1383 = vmatprep.subr.bf16.mxu0 %v2730_v0  ;;  %v2735_v3 = vld [vmem:[#allocation5 + $0x18] ss:$12 sps:$4 sm:$0xff]   ;;  %v2736_v4 = vld [vmem:[#allocation5 + $0x34] ss:$12 sps:$4 sm:$0xff]  }
  0xa3   : > { %1384 = vmatpush1.bf16.msra.mxu0 %v2732_v1  ;;  %v2738_v5 = vld [vmem:[#allocation5 + $0x30] ss:$12 sps:$4 sm:$0xff]   ;;  %v2739_v6 = vld [vmem:[#allocation5 + $0x4c] ss:$12 sps:$4 sm:$0xff]   ;;  %v2741_v7 = vld [vmem:[#allocation5 + $0x48] ss:$12 sps:$4 sm:$0xff]  }
  0xa4   : > { %1385 = vmatprep.subr.bf16.mxu0 %v2733_v2  ;;  %v2742_v8 = vld [vmem:[#allocation5 + $0x64] ss:$12 sps:$4 sm:$0xff]   ;;  %v2744_v9 = vld [vmem:[#allocation5 + $0x60] ss:$12 sps:$4 sm:$0xff]   ;;  %v2745_v10 = vld [vmem:[#allocation5 + $0x7c] ss:$12 sps:$4 sm:$0xff]  }
  0xa5   : > { %v2747_v11 = vld [vmem:[#allocation5 + $0x78] ss:$12 sps:$4 sm:$0xff]   ;;  %v2748_v12 = vld [vmem:[#allocation5 + $0x94] ss:$12 sps:$4 sm:$0xff]   ;;  %v2750_v16 = vld [vmem:[#allocation5 + $0x90] ss:$12 sps:$4 sm:$0xff]  }
  0xa6   : > { %v362_v13 = vld [vmem:[%s3393_s10 + $0x8] sm:$0xff]  ;;  %v369_v14 = vld [vmem:[%s3393_s10 + $0x40] sm:$0xff]  ;;  %v368_v51 = vld [vmem:[%s3393_s10 + $0x38] sm:$0xff]  ;;  %vm1379_vm0 = vcmask 130048   ;;  %vm3157_vm1 = vmmov 0   ;;  %s2273_s14 = sshll.u32 %s3389_s19, 3 }
  0xa7   : > { %1386 = vmatpush1.bf16.msra.mxu0 %v2735_v3  ;;  %v376_v15 = vpack.c.bf16 %v369_v14, %v362_v13  ;;  %v2751_v17 = vld [vmem:[#allocation5 + $0xac] ss:$12 sps:$4 sm:$0xff]   ;;  %v2753_v18 = vld [vmem:[#allocation5 + $0xa8] ss:$12 sps:$4 sm:$0xff]   ;;  %v2754_v21 = vld [vmem:[#allocation5 + $0xc4] ss:$12 sps:$4 sm:$0xff]  }
  0xa8   : > { %1387 = vmatprep.subr.bf16.mxu0 %v2736_v4  ;;  %v2784_v19 = vld [vmem:[#allocation5 + $0xc8] ss:$12 sps:$4 sm:$0xff]   ;;  %v2789_v22 = vld [vmem:[#allocation5 + $0xe0] ss:$12 sps:$4 sm:$0xff]   ;;  %v2794_v26 = vld [vmem:[#allocation5 + $0xf8] ss:$12 sps:$4 sm:$0xff]  }
  0xa9   : > { %1415 = vmatprep.mubr.bf16.mxu0 %v376_v15  ;;  %1587 = vmatprep.mubr.bf16.mxu1 %v376_v15  ;;  %v2785_v20 = vld [vmem:[#allocation5 + $0x8] ss:$12 sps:$4 sm:$0xff]   ;;  %v2790_v23 = vld [vmem:[#allocation5 + $0x20] ss:$12 sps:$4 sm:$0xff]   ;;  %v2795_v27 = vld [vmem:[#allocation5 + $0x38] ss:$12 sps:$4 sm:$0xff]  }
  0xaa   : > { %2476 = vmatprep.subr.bf16.mxu1 %v2784_v19  ;;  %v2756_v24 = vld [vmem:[#allocation5 + $0xc0] ss:$12 sps:$4 sm:$0xff]   ;;  %v2757_v25 = vld [vmem:[#allocation5 + $0xdc] ss:$12 sps:$4 sm:$0xff]   ;;  %v2759_v28 = vld [vmem:[#allocation5 + $0xd8] ss:$12 sps:$4 sm:$0xff]  }
  0xab   : > { %1388 = vmatpush1.bf16.msra.mxu0 %v2738_v5  ;;  %2477 = vmatpush3.bf16.msra.mxu1 %v2785_v20  ;;  %v2760_v29 = vld [vmem:[#allocation5 + $0xf4] ss:$12 sps:$4 sm:$0xff]   ;;  %v2799_v30 = vld [vmem:[#allocation5 + $0x110] ss:$12 sps:$4 sm:$0xff]   ;;  %v2763_v34 = vld [vmem:[#allocation5 + $0x10c] ss:$12 sps:$4 sm:$0xff]  }
  0xac   : > { %1389 = vmatprep.subr.bf16.mxu0 %v2739_v6  ;;  %2478 = vmatprep.subr.bf16.mxu1 %v2789_v22  ;;  %v2800_v31 = vld [vmem:[#allocation5 + $0x50] ss:$12 sps:$4 sm:$0xff]   ;;  %v2804_v33 = vld [vmem:[#allocation5 + $0x128] ss:$12 sps:$4 sm:$0xff]   ;;  %v2809_v36 = vld [vmem:[#allocation5 + $0x140] ss:$12 sps:$4 sm:$0xff]  }
  0xad   : > { %v2762_v32 = vld [vmem:[#allocation5 + $0xf0] ss:$12 sps:$4 sm:$0xff]   ;;  %v2805_v35 = vld [vmem:[#allocation5 + $0x68] ss:$12 sps:$4 sm:$0xff]   ;;  %v2810_v39 = vld [vmem:[#allocation5 + $0x80] ss:$12 sps:$4 sm:$0xff]  }
  0xae   : > { %v2765_v37 = vld [vmem:[#allocation5 + $0x108] ss:$12 sps:$4 sm:$0xff]   ;;  %v2766_v38 = vld [vmem:[#allocation5 + $0x124] ss:$12 sps:$4 sm:$0xff]   ;;  %v2768_v41 = vld [vmem:[#allocation5 + $0x120] ss:$12 sps:$4 sm:$0xff]  }
  0xaf   : > { %1390 = vmatpush1.bf16.msra.mxu0 %v2741_v7  ;;  %2479 = vmatpush3.bf16.msra.mxu1 %v2790_v23  ;;  %v2814_v40 = vld [vmem:[#allocation5 + $0x158] ss:$12 sps:$4 sm:$0xff]   ;;  %v2769_v42 = vld [vmem:[#allocation5 + $0x13c] ss:$12 sps:$4 sm:$0xff]   ;;  %v2772_v46 = vld [vmem:[#allocation5 + $0x154] ss:$12 sps:$4 sm:$0xff]  }
  0xb0   : > { %1391 = vmatprep.subr.bf16.mxu0 %v2742_v8  ;;  %2480 = vmatprep.subr.bf16.mxu1 %v2794_v26  ;;  %v2815_v43 = vld [vmem:[#allocation5 + $0x98] ss:$12 sps:$4 sm:$0xff]   ;;  %v2819_v44 = vld [vmem:[#allocation5 + $0x170] ss:$12 sps:$4 sm:$0xff]   ;;  %v2824_v50 = vld [vmem:[#allocation5 + $0x248] ss:$12 sps:$4 sm:$0xff]  }
  0xb1   : > { %v2771_v45 = vld [vmem:[#allocation5 + $0x138] ss:$12 sps:$4 sm:$0xff]   ;;  %v2774_v47 = vld [vmem:[#allocation5 + $0x150] ss:$12 sps:$4 sm:$0xff]   ;;  %v2825_v53 = vld [vmem:[#allocation5 + $0x188] ss:$12 sps:$4 sm:$0xff]  }
  0xb2   : > { %v361_v48 = vld [vmem:[%s3393_s10] sm:$0xff]  ;;  %v2775_v52 = vld [vmem:[#allocation5 + $0x16c] ss:$12 sps:$4 sm:$0xff]   ;;  %v2783_v61 = vld [vmem:[#allocation5 + $0x19c] ss:$12 sps:$4 sm:$0xff]   ;;  %s348_s1 = scalar_lea.vmem [#allocation10], %s2273_s14 }
  0xb3   : > { %1392 = vmatpush1.bf16.msra.mxu0 %v2744_v9  ;;  %2481 = vmatpush3.bf16.msra.mxu1 %v2795_v27  ;;  %v2820_v49 = vld [vmem:[#allocation5 + $0xb0] ss:$12 sps:$4 sm:$0xff]   ;;  %v375_v54 = vpack.c.bf16 %v368_v51, %v361_v48  ;;  %v2829_v55 = vld [vmem:[#allocation5 + $0x260] ss:$12 sps:$4 sm:$0xff]   ;;  %v2777_v56 = vld [vmem:[#allocation5 + $0x168] ss:$12 sps:$4 sm:$0xff]  }
  0xb4   : > { %1393 = vmatprep.subr.bf16.mxu0 %v2745_v10  ;;  %2482 = vmatprep.subr.bf16.mxu1 %v2799_v30  ;;  %v2780_v57 = vld [vmem:[#allocation5 + $0x184] ss:$12 sps:$4 sm:$0xff]   ;;  %v2830_v58 = vld [vmem:[#allocation5 + $0x1a0] ss:$12 sps:$4 sm:$0xff]   ;;  %v2844_v3 = vld [vmem:[#allocation5 + $0x2a8] ss:$12 sps:$4 sm:$0xff]  }
  0xb5   : > { %v2834_v59 = vld [vmem:[#allocation5 + $0x278] ss:$12 sps:$4 sm:$0xff]   ;;  %v2778_v60 = vld [vmem:[#allocation5 + $0x180] ss:$12 sps:$4 sm:$0xff]   ;;  %v2839_v63 = vld [vmem:[#allocation5 + $0x290] ss:$12 sps:$4 sm:$0xff]  }
  0xb6   : > { %v2835_v62 = vld [vmem:[#allocation5 + $0x1b8] ss:$12 sps:$4 sm:$0xff]   ;;  %v2788_v1 = vld [vmem:[#allocation5 + $0x1b4] ss:$12 sps:$4 sm:$0xff]   ;;  %v2840_v2 = vld [vmem:[#allocation5 + $0x1d0] ss:$12 sps:$4 sm:$0xff]  }
  0xb7   : > { %1394 = vmatpush1.bf16.msra.mxu0 %v2747_v11  ;;  %2483 = vmatpush3.bf16.msra.mxu1 %v2800_v31  ;;  %v2781_v0 = vld [vmem:[#allocation5 + $0x198] ss:$12 sps:$4 sm:$0xff]   ;;  %v2786_v4 = vld [vmem:[#allocation5 + $0x1b0] ss:$12 sps:$4 sm:$0xff]   ;;  %v2845_v6 = vld [vmem:[#allocation5 + $0x1e8] ss:$12 sps:$4 sm:$0xff]  }
  0xb8   : > { %1395 = vmatprep.subr.bf16.mxu0 %v2748_v12  ;;  %2484 = vmatprep.subr.bf16.mxu1 %v2804_v33  ;;  %v2793_v5 = vld [vmem:[#allocation5 + $0x1cc] ss:$12 sps:$4 sm:$0xff]   ;;  %v371_v9 = vld [vmem:[%s3393_s10 + $0x50] sm:$0xff]  ;;  %s2135_s9 = scalar_lea.sflag [#allocation4], %s3389_s19  ;;  %p3564_p10 = scmp.ne.s32.totalorder %s3550_s13, 0 }
  0xb9   : > { %v2849_v7 = vld [vmem:[#allocation5 + $0x2c0] ss:$12 sps:$4 sm:$0xff]   ;;  %v2791_v10 = vld [vmem:[#allocation5 + $0x1c8] ss:$12 sps:$4 sm:$0xff]   ;;  %v2798_v12 = vld [vmem:[#allocation5 + $0x1e4] ss:$12 sps:$4 sm:$0xff]  }
  0xba   : > { %v364_v8 = vld [vmem:[%s3393_s10 + $0x18] sm:$0xff]  ;;  %v2808_v20 = vld [vmem:[#allocation5 + $0x214] ss:$12 sps:$4 sm:$0xff]   ;;  %v2818_v31 = vld [vmem:[#allocation5 + $0x244] ss:$12 sps:$4 sm:$0xff]   ;;  %s2460_s22 = sshll.u32 (%p3564_p10), %s3223_s28, 1 }
  0xbb   : > { %1396 = vmatpush1.bf16.msra.mxu0 %v2750_v16  ;;  %2485 = vmatpush3.bf16.msra.mxu1 %v2805_v35  ;;  %v378_v11 = vpack.c.bf16 %v371_v9, %v364_v8  ;;  %v2850_v13 = vld [vmem:[#allocation5 + $0x200] ss:$12 sps:$4 sm:$0xff]   ;;  %v2854_v14 = vld [vmem:[#allocation5 + $0x2d8] ss:$12 sps:$4 sm:$0xff]   ;;  %v2803_v16 = vld [vmem:[#allocation5 + $0x1fc] ss:$12 sps:$4 sm:$0xff]  }
  0xbc   : > { %1397 = vmatprep.subr.bf16.mxu0 %v2751_v17  ;;  %2486 = vmatprep.subr.bf16.mxu1 %v2809_v36  ;;  %v2796_v15 = vld [vmem:[#allocation5 + $0x1e0] ss:$12 sps:$4 sm:$0xff]   ;;  %v2855_v17 = vld [vmem:[#allocation5 + $0x218] ss:$12 sps:$4 sm:$0xff]   ;;  %v2860_v22 = vld [vmem:[#allocation5 + $0x230] ss:$12 sps:$4 sm:$0xff]  }
  0xbd   : > { %v2801_v19 = vld [vmem:[#allocation5 + $0x1f8] ss:$12 sps:$4 sm:$0xff]   ;;  %v2865_v27 = vld [vmem:[#allocation5 + $0x308] ss:$12 sps:$4 sm:$0xff]   ;;  %v2890_v51 = vld [vmem:[#allocation5 + $0x380] ss:$12 sps:$4 sm:$0xff]  }
  0xbe   : > { %v363_v23 = vld [vmem:[%s3393_s10 + $0x10] sm:$0xff]  ;;  %v2813_v26 = vld [vmem:[#allocation5 + $0x22c] ss:$12 sps:$4 sm:$0xff]   ;;  %v2823_v35 = vld [vmem:[#allocation5 + $0x25c] ss:$12 sps:$4 sm:$0xff]   ;;  %s2143_s8 = ssub.s32 (%p3564_p10), 5, %s2460_s22 }
  0xbf   : > { %1398 = vmatpush1.bf16.msra.mxu0 %v2753_v18  ;;  %2487 = vmatpush3.bf16.msra.mxu1 %v2810_v39  ;;  %v2859_v18 = vld [vmem:[#allocation5 + $0x2f0] ss:$12 sps:$4 sm:$0xff]   ;;  %v2811_v30 = vld [vmem:[#allocation5 + $0x228] ss:$12 sps:$4 sm:$0xff]   ;;  %v2874_v33 = vld [vmem:[#allocation5 + $0x3f8] ss:$12 sps:$4 sm:$0xff]  }
  0xc0   : > { %1399 = vmatprep.subr.bf16.mxu0 %v2754_v21  ;;  %2488 = vmatprep.subr.bf16.mxu1 %v2814_v40  ;;  %v2806_v21 = vld [vmem:[#allocation5 + $0x210] ss:$12 sps:$4 sm:$0xff]   ;;  %v2875_v36 = vld [vmem:[#allocation5 + $0x338] ss:$12 sps:$4 sm:$0xff]   ;;  %v2828_v39 = vld [vmem:[#allocation5 + $0x274] ss:$12 sps:$4 sm:$0xff]  }
  0xc1   : > { %v2880_v40 = vld [vmem:[#allocation5 + $0x350] ss:$12 sps:$4 sm:$0xff]   ;;  %p2144_p1 = scmp.lt.s32.totalorder (%p3564_p10), %s2143_s8, 2 }
  0xc2   : > { %v2863_v8 = vld [vmem:[#allocation5 + $0x31c] ss:$12 sps:$4 sm:$0xff]  }
  0xc3   : > { %1400 = vmatpush1.bf16.msra.mxu0 %v2756_v24  ;;  %2489 = vmatpush3.bf16.msra.mxu1 %v2815_v43  ;;  %v2864_v24 = vld [vmem:[#allocation5 + $0x3c8] ss:$12 sps:$4 sm:$0xff]   ;;  %v2833_v43 = vld [vmem:[#allocation5 + $0x28c] ss:$12 sps:$4 sm:$0xff]  }
  0xc4   : > { %1401 = vmatprep.subr.bf16.mxu0 %v2757_v25  ;;  %2490 = vmatprep.subr.bf16.mxu1 %v2819_v44  ;;  %v370_v25 = vld [vmem:[%s3393_s10 + $0x48] sm:$0xff] }
  0xc5   : > { %v2885_v44 = vld [vmem:[#allocation5 + $0x368] ss:$12 sps:$4 sm:$0xff]  }
  0xc7   : > { %1402 = vmatpush1.bf16.msra.mxu0 %v2759_v28  ;;  %2491 = vmatpush3.bf16.msra.mxu1 %v2820_v49  ;;  %v3415_v28 = vpack.c.bf16 %v370_v25, %v363_v23  ;;  %v2831_v49 = vld [vmem:[#allocation5 + $0x288] ss:$12 sps:$4 sm:$0xff]   ;;  %v2898_v23 = vld [vmem:[#allocation5 + $0x3c4] ss:$12 sps:$4 sm:$0xff]  }
  0xc8   : > { %1403 = vmatprep.subr.bf16.mxu0 %v2760_v29  ;;  %2498 = vmatprep.subr.bf16.mxu1 %v2824_v50  ;;  %v2869_v29 = vld [vmem:[#allocation5 + $0x3e0] ss:$12 sps:$4 sm:$0xff]   ;;  %v2838_v50 = vld [vmem:[#allocation5 + $0x2a4] ss:$12 sps:$4 sm:$0xff]   ;;  %v2903_v25 = vld [vmem:[#allocation5 + $0x3dc] ss:$12 sps:$4 sm:$0xff]  }
  0xca   : > { %1588 = vmatmul.mubr.bf16.vlgmr.msra.gmra.mrb[0].mxu1 %v375_v54 }
  0xcb   : > { %1404 = vmatpush1.bf16.msra.mxu0 %v2762_v32  ;;  %2499 = vmatpush3.bf16.msra.mxu1 %v2825_v53  ;;  %v2870_v32 = vld [vmem:[#allocation5 + $0x320] ss:$12 sps:$4 sm:$0xff]  }
  0xcc   : > { %1405 = vmatprep.subr.bf16.mxu0 %v2763_v34  ;;  %2500 = vmatprep.subr.bf16.mxu1 %v2829_v55  ;;  %v2816_v34 = vld [vmem:[#allocation5 + $0x240] ss:$12 sps:$4 sm:$0xff]   ;;  %v2895_v55 = vld [vmem:[#allocation5 + $0x398] ss:$12 sps:$4 sm:$0xff]  }
  0xcd   : > { %1628 = vmatprep.mubr.bf16.mxu1 %v378_v11  ;;  %v2836_v53 = vld [vmem:[#allocation5 + $0x2a0] ss:$12 sps:$4 sm:$0xff]  }
  0xcf   : > { %1406 = vmatpush1.bf16.msra.mxu0 %v2765_v37  ;;  %2501 = vmatpush3.bf16.msra.mxu1 %v2830_v58  ;;  %v2879_v37 = vld [vmem:[#allocation5 + $0x410] ss:$12 sps:$4 sm:$0xff]   ;;  %v2848_v58 = vld [vmem:[#allocation5 + $0x2d4] ss:$12 sps:$4 sm:$0xff]  }
  0xd0   : > { %1407 = vmatprep.subr.bf16.mxu0 %v2766_v38  ;;  %2502 = vmatprep.subr.bf16.mxu1 %v2834_v59  ;;  %v2821_v38 = vld [vmem:[#allocation5 + $0x258] ss:$12 sps:$4 sm:$0xff]   ;;  %v2900_v59 = vld [vmem:[#allocation5 + $0x3b0] ss:$12 sps:$4 sm:$0xff]  }
  0xd3   : > { %1408 = vmatpush1.bf16.msra.mxu0 %v2768_v41  ;;  %2503 = vmatpush3.bf16.msra.mxu1 %v2835_v62  ;;  %v2884_v41 = vld [vmem:[#allocation5 + $0x428] ss:$12 sps:$4 sm:$0xff]   ;;  %v2846_v62 = vld [vmem:[#allocation5 + $0x2d0] ss:$12 sps:$4 sm:$0xff]  }
  0xd4   : > { %1409 = vmatprep.subr.bf16.mxu0 %v2769_v42  ;;  %2504 = vmatprep.subr.bf16.mxu1 %v2839_v63  ;;  %v2826_v42 = vld [vmem:[#allocation5 + $0x270] ss:$12 sps:$4 sm:$0xff]   ;;  %v2853_v63 = vld [vmem:[#allocation5 + $0x2ec] ss:$12 sps:$4 sm:$0xff]  }
  0xd7   : > { %1410 = vmatpush1.bf16.msra.mxu0 %v2771_v45  ;;  %2505 = vmatpush3.bf16.msra.mxu1 %v2840_v2  ;;  %v366_v45 = vld [vmem:[%s3393_s10 + $0x28] sm:$0xff] }
  0xd8   : > { %1411 = vmatprep.subr.bf16.mxu0 %v2772_v46  ;;  %2506 = vmatprep.subr.bf16.mxu1 %v2844_v3  ;;  %v373_v46 = vld [vmem:[%s3393_s10 + $0x60] sm:$0xff] }
  0xd9   : > { %v380_v48 = vpack.c.bf16 %v373_v46, %v366_v45  ;;  %v2851_v2 = vld [vmem:[#allocation5 + $0x2e8] ss:$12 sps:$4 sm:$0xff]   ;;  %v2858_v3 = vld [vmem:[#allocation5 + $0x304] ss:$12 sps:$4 sm:$0xff]  }
  0xda   : > { %v2929_v45 = vld [vmem:[#allocation7 + $0x8] sm:$0xff]   ;;  %v2930_v46 = vld [vmem:[#allocation7 + $0x50] sm:$0xff]  }
  0xdb   : > { %1412 = vmatpush1.bf16.msra.mxu0 %v2774_v47  ;;  %2507 = vmatpush3.bf16.msra.mxu1 %v2845_v6  ;;  %v2889_v47 = vld [vmem:[#allocation5 + $0x440] ss:$12 sps:$4 sm:$0xff]  }
  0xdc   : > { %1413 = vmatprep.subr.bf16.mxu0 %v2775_v52  ;;  %2508 = vmatprep.subr.bf16.mxu1 %v2849_v7  ;;  %v2894_v52 = vld [vmem:[#allocation5 + $0x458] ss:$12 sps:$4 sm:$0xff]   ;;  %v2856_v7 = vld [vmem:[#allocation5 + $0x300] ss:$12 sps:$4 sm:$0xff]  }
  0xdd   : > { %v374_v6 = vld [vmem:[%s3393_s10 + $0x68] sm:$0xff] }
  0xdf   : > { %1414 = vmatpush1.bf16.msra.mxu0 %v2777_v56  ;;  %2509 = vmatpush3.bf16.msra.mxu1 %v2850_v13  ;;  %v2841_v56 = vld [vmem:[#allocation5 + $0x2b8] ss:$12 sps:$4 sm:$0xff]  }
  0xe0   : > { %1426 = vmatprep.subr.bf16.mxu0 %v2780_v57  ;;  %2510 = vmatprep.subr.bf16.mxu1 %v2854_v14  ;;  %v2899_v57 = vld [vmem:[#allocation5 + $0x470] ss:$12 sps:$4 sm:$0xff]   ;;  %v2873_v13 = vld [vmem:[#allocation5 + $0x34c] ss:$12 sps:$4 sm:$0xff]   ;;  %v2871_v14 = vld [vmem:[#allocation5 + $0x348] ss:$12 sps:$4 sm:$0xff]  }
  0xe2   : > { %1416 = vmatmul.mubr.bf16.vlgmr.msra.gmra.mrb[0].mxu0 %v375_v54  ;;  %v2843_v54 = vld [vmem:[#allocation5 + $0x2bc] ss:$12 sps:$4 sm:$0xff]  }
  0xe3   : > { %1427 = vmatpush1.bf16.msra.mxu0 %v2778_v60  ;;  %1458 = vmatprep.mubr.bf16.mxu0 %v378_v11  ;;  %v365_v60 = vld [vmem:[%s3393_s10 + $0x20] sm:$0xff] }
  0xe4   : > { %1428 = vmatprep.subr.bf16.mxu0 %v2783_v61  ;;  %2511 = vmatpush3.bf16.msra.mxu1 %v2855_v17  ;;  %v372_v61 = vld [vmem:[%s3393_s10 + $0x58] sm:$0xff]  ;;  %v2868_v11 = vld [vmem:[#allocation5 + $0x334] ss:$12 sps:$4 sm:$0xff]  }
  0xe5   : > { %2512 = vmatprep.subr.bf16.mxu1 %v2859_v18  ;;  %v2883_v17 = vld [vmem:[#allocation5 + $0x37c] ss:$12 sps:$4 sm:$0xff]   ;;  %v2881_v18 = vld [vmem:[#allocation5 + $0x378] ss:$12 sps:$4 sm:$0xff]  }
  0xe7   : > { %1429 = vmatpush1.bf16.msra.mxu0 %v2781_v0  ;;  %v2907_v0 = vld [vmem:[#allocation5 + $0x488] ss:$12 sps:$4 sm:$0xff]  }
  0xe8   : > { %1430 = vmatprep.subr.bf16.mxu0 %v2788_v1  ;;  %2513 = vmatpush3.bf16.msra.mxu1 %v2860_v22  ;;  %v3422_v1 = vpack.c.bf16 %v372_v61, %v365_v60  ;;  %v2891_v22 = vld [vmem:[#allocation5 + $0x3a8] ss:$12 sps:$4 sm:$0xff]   ;;  %v580_v60 = vlaneseq }
  0xe9   : > { %2520 = vmatprep.subr.bf16.mxu1 %v2864_v24  ;;  %v2896_v24 = vld [vmem:[#allocation5 + $0x3c0] ss:$12 sps:$4 sm:$0xff]  }
  0xea   : > { %v2938_v61 = vld [vmem:[#allocation7 + $0x70] sm:$0xff]  }
  0xeb   : > { %1431 = vmatpush1.bf16.msra.mxu0 %v2786_v4  ;;  %1629 = vmatmul.mubr.bf16.vlgmr.msra.gmra.mrb[4].mxu1 %v3415_v28  ;;  %v3156_v4 = vmov 0.0  }
  0xec   : > { %1432 = vmatprep.subr.bf16.mxu0 %v2793_v5  ;;  %2521 = vmatpush3.bf16.msra.mxu1 %v2865_v27  ;;  %v367_v5 = vld [vmem:[%s3393_s10 + $0x30] sm:$0xff] }
  0xed   : > { %2522 = vmatprep.subr.bf16.mxu1 %v2869_v29  ;;  %1669 = vmatprep.mubr.bf16.mxu1 %v380_v48  ;;  %v3430_v9 = vpack.c.bf16 %v374_v6, %v367_v5  ;;  %v2906_v27 = vld [vmem:[#allocation5 + $0x3f4] ss:$12 sps:$4 sm:$0xff]   ;;  %v2910_v29 = vld [vmem:[#allocation5 + $0x40c] ss:$12 sps:$4 sm:$0xff]  }
  0xef   : > { %1433 = vmatpush1.bf16.msra.mxu0 %v2791_v10  ;;  %v2861_v10 = vld [vmem:[#allocation5 + $0x318] ss:$12 sps:$4 sm:$0xff]  }
  0xf0   : > { %1434 = vmatprep.subr.bf16.mxu0 %v2798_v12  ;;  %2523 = vmatpush3.bf16.msra.mxu1 %v2870_v32  ;;  %v2866_v12 = vld [vmem:[#allocation5 + $0x330] ss:$12 sps:$4 sm:$0xff]   ;;  %v2911_v32 = vld [vmem:[#allocation5 + $0x420] ss:$12 sps:$4 sm:$0xff]  }
  0xf1   : > { %2524 = vmatprep.subr.bf16.mxu1 %v2874_v33  ;;  %v2916_v33 = vld [vmem:[#allocation5 + $0x43c] ss:$12 sps:$4 sm:$0xff]  }
  0xf3   : > { %1435 = vmatpush1.bf16.msra.mxu0 %v2796_v15  ;;  %v2878_v15 = vld [vmem:[#allocation5 + $0x364] ss:$12 sps:$4 sm:$0xff]  }
  0xf4   : > { %1436 = vmatprep.subr.bf16.mxu0 %v2803_v16  ;;  %2525 = vmatpush3.bf16.msra.mxu1 %v2875_v36  ;;  %v2876_v16 = vld [vmem:[#allocation5 + $0x360] ss:$12 sps:$4 sm:$0xff]   ;;  %v2917_v36 = vld [vmem:[#allocation5 + $0x450] ss:$12 sps:$4 sm:$0xff]  }
  0xf5   : > { %2526 = vmatprep.subr.bf16.mxu1 %v2879_v37  ;;  %v2922_v37 = vld [vmem:[#allocation5 + $0x46c] ss:$12 sps:$4 sm:$0xff]  }
  0xf7   : > { %1437 = vmatpush1.bf16.msra.mxu0 %v2801_v19  ;;  %v2888_v19 = vld [vmem:[#allocation5 + $0x394] ss:$12 sps:$4 sm:$0xff]  }
  0xf8   : > { %1438 = vmatprep.subr.bf16.mxu0 %v2808_v20  ;;  %2527 = vmatpush3.bf16.msra.mxu1 %v2880_v40  ;;  %v2886_v20 = vld [vmem:[#allocation5 + $0x390] ss:$12 sps:$4 sm:$0xff]   ;;  %v2923_v40 = vld [vmem:[#allocation5 + $0x480] ss:$12 sps:$4 sm:$0xff]  }
  0xf9   : > { %2528 = vmatprep.subr.bf16.mxu1 %v2884_v41  ;;  %v3158_v41 = vmov 0  }
  0xfb   : > { %1439 = vmatpush1.bf16.msra.mxu0 %v2806_v21  ;;  %v2893_v21 = vld [vmem:[#allocation5 + $0x3ac] ss:$12 sps:$4 sm:$0xff]  }
  0xfc   : > { %1440 = vmatprep.subr.bf16.mxu0 %v2813_v26  ;;  %2529 = vmatpush3.bf16.msra.mxu1 %v2885_v44  ;;  %v2901_v26 = vld [vmem:[#allocation5 + $0x3d8] ss:$12 sps:$4 sm:$0xff]  }
  0xfd   : > { %2530 = vmatprep.subr.bf16.mxu1 %v2889_v47  ;;  %v2928_v44 = vld [vmem:[#allocation7 + $0x48] sm:$0xff]   ;;  %v2931_v47 = vld [vmem:[#allocation7 + $0x10] sm:$0xff]  }
  0xff   : > { %1441 = vmatpush1.bf16.msra.mxu0 %v2811_v30  ;;  %v2908_v30 = vld [vmem:[#allocation5 + $0x408] ss:$12 sps:$4 sm:$0xff]  }
 0x100   : > { %1442 = vmatprep.subr.bf16.mxu0 %v2818_v31  ;;  %2531 = vmatpush3.bf16.msra.mxu1 %v2890_v51  ;;  %v2913_v31 = vld [vmem:[#allocation5 + $0x424] ss:$12 sps:$4 sm:$0xff]   ;;  %v2935_v51 = vld [vmem:[#allocation7 + $0x20] sm:$0xff]  }
 0x101   : > { %2532 = vmatprep.subr.bf16.mxu1 %v2894_v52  ;;  %v2936_v52 = vld [vmem:[#allocation7 + $0x68] sm:$0xff]  }
 0x103   : > { %1443 = vmatpush1.bf16.msra.mxu0 %v2816_v34  ;;  %v2914_v34 = vld [vmem:[#allocation5 + $0x438] ss:$12 sps:$4 sm:$0xff]  }
 0x104   : > { %1444 = vmatprep.subr.bf16.mxu0 %v2823_v35  ;;  %2533 = vmatpush3.bf16.msra.mxu1 %v2895_v55  ;;  %v2919_v35 = vld [vmem:[#allocation5 + $0x454] ss:$12 sps:$4 sm:$0xff]  }
 0x105   : > { %2534 = vmatprep.subr.bf16.mxu1 %v2899_v57 }
 0x107   : > { %1445 = vmatpush1.bf16.msra.mxu0 %v2821_v38  ;;  %v2920_v38 = vld [vmem:[#allocation5 + $0x468] ss:$12 sps:$4 sm:$0xff]  }
 0x108   : > { %1446 = vmatprep.subr.bf16.mxu0 %v2828_v39  ;;  %2535 = vmatpush3.bf16.msra.mxu1 %v2900_v59  ;;  %v2925_v39 = vld [vmem:[#allocation5 + $0x484] ss:$12 sps:$4 sm:$0xff]  }
 0x109   : > { %2584 = vmatprep.subr.bf16.mxu1 %v3156_v4 }
 0x10b   : > { %1447 = vmatpush1.bf16.msra.mxu0 %v2826_v42  ;;  %1670 = vmatmul.mubr.bf16.vlgmr.msra.gmra.mrb[8].mxu1 %v3422_v1  ;;  %v2926_v42 = vld [vmem:[#allocation7 + $0x40] sm:$0xff]  }
 0x10c   : > { %1448 = vmatprep.subr.bf16.mxu0 %v2833_v43  ;;  %2585 = vmatpush3.bf16.msra.mxu1 %v2907_v0  ;;  %v2927_v43 = vld [vmem:[#allocation7] sm:$0xff]   ;;  %v2940_v0 = vld [vmem:[#allocation7 + $0x78] sm:$0xff]  }
 0x10d   : > { %2586 = vmatprep.mubr.msk.bf16.mxu1 %vm3157_vm1, %v3156_v4  ;;  %2544 = vmatprep.subr.bf16.mxu1 %v2926_v42 }
 0x10f   : > { %1449 = vmatpush1.bf16.msra.mxu0 %v2831_v49  ;;  %v2933_v49 = vld [vmem:[#allocation7 + $0x18] sm:$0xff]  }
 0x110   : > { %1450 = vmatprep.subr.bf16.mxu0 %v2838_v50  ;;  %v2934_v50 = vld [vmem:[#allocation7 + $0x60] sm:$0xff]  }
 0x113   : > { %1451 = vmatpush1.bf16.msra.mxu0 %v2836_v53  ;;  %2587 = vmatmul.mubr.msk.bf16.vlgmr.msra.gmra.mrb[12].mxu1 %vm1379_vm0, %v3430_v9  ;;  %v2937_v53 = vld [vmem:[#allocation7 + $0x28] sm:$0xff]  }
 0x114   : > { %1452 = vmatprep.subr.bf16.mxu0 %v2843_v54  ;;  %2545 = vmatpush3.bf16.msra.mxu1 %v2927_v43 }
 0x115   : > { %2546 = vmatprep.subr.bf16.mxu1 %v2928_v44 }
 0x117   : > { %1453 = vmatpush1.bf16.msra.mxu0 %v2841_v56 }
 0x118   : > { %1454 = vmatprep.subr.bf16.mxu0 %v2848_v58  ;;  %2547 = vmatpush3.bf16.msra.mxu1 %v2929_v45 }
 0x119   : > { %2548 = vmatprep.subr.bf16.mxu1 %v2930_v46 }
 0x11b   : > { %1455 = vmatpush1.bf16.msra.mxu0 %v2846_v62  ;;  %v2939_v62 = vld [vmem:[#allocation7 + $0x30] sm:$0xff]  }
 0x11c   : > { %1456 = vmatprep.subr.bf16.mxu0 %v2853_v63  ;;  %2549 = vmatpush3.bf16.msra.mxu1 %v2931_v47  ;;  %v581_v63 = vshrl.u32 %v580_v60, 7  ;;  %v2951_v60 = vld [vmem:[#allocation8 + $0x8] sm:$0xff]  }
 0x11f   : > { %1457 = vmatpush1.bf16.msra.mxu0 %v2851_v2  ;;  %v590_v2 = vsub.s32 2, %v581_v63 }
 0x120   : > { %1469 = vmatprep.subr.bf16.mxu0 %v2858_v3  ;;  %v578_v3 = vld [vmem:[%s3531_s2] sm:$0x7] }
 0x121   : > { %v591_v5 = vrot.slane %v578_v3, %v590_v2  ;;  %v2957_v2 = vld [vmem:[#allocation8 + $0x38] sm:$0xff]  }
 0x122   : > { %1459 = vmatmul.mubr.bf16.vlgmr.msra.gmra.mrb[0].mxu0 %v3415_v28  ;;  %v2904_v28 = vld [vmem:[#allocation5 + $0x3f0] ss:$12 sps:$4 sm:$0xff]  }
 0x123   : > { %1470 = vmatpush1.bf16.msra.mxu0 %v2856_v7  ;;  %1501 = vmatprep.mubr.bf16.mxu0 %v380_v48  ;;  %v2932_v48 = vld [vmem:[#allocation7 + $0x58] sm:$0xff]  }
 0x124   : > { %1471 = vmatprep.subr.bf16.mxu0 %v2863_v8  ;;  %2550 = vmatprep.subr.bf16.mxu1 %v2932_v48 }
 0x125   : > { %2551 = vmatpush3.bf16.msra.mxu1 %v2933_v49 }
 0x126   : > { %2552 = vmatprep.subr.bf16.mxu1 %v2934_v50 }
 0x127   : > { %1472 = vmatpush1.bf16.msra.mxu0 %v2861_v10 }
 0x128   : > { %1473 = vmatprep.subr.bf16.mxu0 %v2868_v11 }
 0x129   : > { %2553 = vmatpush3.bf16.msra.mxu1 %v2935_v51  ;;  %v2942_v51 = vld [vmem:[#allocation7 + $0x80] sm:$0xff]  }
 0x12a   : > { %2554 = vmatprep.subr.bf16.mxu1 %v2936_v52  ;;  %v2943_v52 = vld [vmem:[#allocation7 + $0x88] sm:$0xff]  }
 0x12b   : > { %1474 = vmatpush1.bf16.msra.mxu0 %v2866_v12 }
 0x12c   : > { %1475 = vmatprep.subr.bf16.mxu0 %v2873_v13 }
 0x12d   : > { %2555 = vmatpush3.bf16.msra.mxu1 %v2937_v53  ;;  %v2944_v53 = vld [vmem:[#allocation7 + $0x90] sm:$0xff]  }
 0x12e   : > { %2556 = vmatprep.subr.bf16.mxu1 %v2938_v61  ;;  %v2952_v61 = vld [vmem:[#allocation8 + $0x10] sm:$0xff]  }
 0x12f   : > { %1476 = vmatpush1.bf16.msra.mxu0 %v2871_v14 }
 0x130   : > { %1477 = vmatprep.subr.bf16.mxu0 %v2878_v15 }
 0x131   : > { %2557 = vmatpush3.bf16.msra.mxu1 %v2939_v62  ;;  %v2953_v62 = vld [vmem:[#allocation8 + $0x18] sm:$0xff]  }
 0x132   : > { %2558 = vmatprep.subr.bf16.mxu1 %v2940_v0  ;;  %v2955_v0 = vld [vmem:[#allocation8 + $0x28] sm:$0xff]  }
 0x133   : > { %1478 = vmatpush1.bf16.msra.mxu0 %v2876_v16 }
 0x134   : > { %1479 = vmatprep.subr.bf16.mxu0 %v2883_v17 }
 0x137   : > { %1480 = vmatpush1.bf16.msra.mxu0 %v2881_v18 }
 0x138   : > { %1481 = vmatprep.subr.bf16.mxu0 %v2888_v19 }
 0x13b   : > { %1482 = vmatpush1.bf16.msra.mxu0 %v2886_v20 }
 0x13c   : > { %1483 = vmatprep.subr.bf16.mxu0 %v2893_v21 }
 0x13f   : > { %1484 = vmatpush1.bf16.msra.mxu0 %v2891_v22 }
 0x140   : > { %1485 = vmatprep.subr.bf16.mxu0 %v2898_v23 }
 0x143   : > { %1486 = vmatpush1.bf16.msra.mxu0 %v2896_v24 }
 0x144   : > { %1487 = vmatprep.subr.bf16.mxu0 %v2903_v25 }
 0x147   : > { %1488 = vmatpush1.bf16.msra.mxu0 %v2901_v26 }
 0x148   : > { %1489 = vmatprep.subr.bf16.mxu0 %v2906_v27 }
 0x14b   : > { %1490 = vmatpush1.bf16.msra.mxu0 %v2904_v28 }
 0x14c   : > { %1491 = vmatprep.subr.bf16.mxu0 %v2910_v29 }
 0x14f   : > { %1492 = vmatpush1.bf16.msra.mxu0 %v2908_v30 }
 0x150   : > { %1493 = vmatprep.subr.bf16.mxu0 %v2913_v31 }
 0x153   : > { %1494 = vmatpush1.bf16.msra.mxu0 %v2911_v32 }
 0x154   : > { %1495 = vmatprep.subr.bf16.mxu0 %v2916_v33  ;;  %v582_v33 = vsub.s32 0, %v581_v63 }
 0x157   : > { %1496 = vmatpush1.bf16.msra.mxu0 %v2914_v34  ;;  %v586_v34 = vsub.s32 1, %v581_v63  ;;  %v2954_v63 = vld [vmem:[#allocation8 + $0x20] sm:$0xff]  }
 0x158   : > { %1497 = vmatprep.subr.bf16.mxu0 %v2919_v35  ;;  %v583_v35 = vrot.slane %v578_v3, %v582_v33 }
 0x15b   : > { %1498 = vmatpush1.bf16.msra.mxu0 %v2917_v36  ;;  %v587_v36 = vrot.slane %v578_v3, %v586_v34 }
 0x15c   : > { %1499 = vmatprep.subr.bf16.mxu0 %v2922_v37 }
 0x15f   : > { %1500 = vmatpush1.bf16.msra.mxu0 %v2920_v38 }
 0x160   : > { %1512 = vmatprep.subr.bf16.mxu0 %v2925_v39 }
 0x162   : > { %1502 = vmatmul.mubr.bf16.vlgmr.msra.gmra.mrb[0].mxu0 %v3422_v1  ;;  %v2941_v1 = vld [vmem:[#allocation7 + $0x38] sm:$0xff]  }
 0x163   : > { %1513 = vmatpush1.bf16.msra.mxu0 %v2923_v40  ;;  %1544 = vmatprep.mubr.bf16.mxu0 %v3158_v41 }
 0x164   : > { %2559 = vmatpush3.bf16.msra.mxu1 %v2941_v1  ;;  %v2956_v1 = vld [vmem:[#allocation8 + $0x30] sm:$0xff]  }
 0x165   : > { %2590 = vmatprep.subr.bf16.mxu1 %v3156_v4 }
 0x16e   : > { %2421 = vmatmul.mubr.msk.bf16.vlgmr.msra.gmra.mrb[0].mxu0 %vm1379_vm0, %v3430_v9 }
 0x19d   : > { %v2492_v54 = vpop.f32.mrb[0].mxu1 }
 0x19e   : > { %v2493_v55 = vpop.f32.mrb[1].mxu1 }
 0x19f   : > { %v2494_v56 = vadd.f32 %v2493_v55, %v2492_v54  ;;  %v2495_v57 = vpop.f32.mrb[2].mxu1  ;;  %v2945_v54 = vld [vmem:[#allocation7 + $0x98] sm:$0xff]   ;;  %v2946_v55 = vld [vmem:[#allocation7 + $0xa0] sm:$0xff]  }
 0x1a0   : > { %v2496_v58 = vpop.f32.mrb[3].mxu1 }
 0x1a1   : > { %v2497_v59 = vadd.f32 %v2496_v58, %v2495_v57  ;;  %v1590_v6 = vadd.f32 %v2494_v56, %v591_v5  ;;  %v2947_v56 = vld [vmem:[#allocation7 + $0xa8] sm:$0xff]   ;;  %v2948_v57 = vld [vmem:[#allocation7 + $0xb0] sm:$0xff]   ;;  %v2949_v58 = vld [vmem:[#allocation7 + $0xb8] sm:$0xff]  }
 0x1a3   : > { %v1593_v9 = vadd.f32 %v2497_v59, %v591_v5  ;;  %v2950_v59 = vld [vmem:[#allocation8] sm:$0xff]  }
 0x1be   : > { %v2514_v7 = vpop.f32.mrb[4].mxu1 }
 0x1bf   : > { %v2515_v8 = vpop.f32.mrb[5].mxu1 }
 0x1c0   : > { %v2516_v10 = vadd.f32 %v2515_v8, %v2514_v7  ;;  %v2517_v11 = vpop.f32.mrb[6].mxu1 }
 0x1c1   : > { %v2518_v12 = vpop.f32.mrb[7].mxu1 }
 0x1c2   : > { %v1631_v13 = vadd.f32 %v2516_v10, %v1590_v6  ;;  %v2519_v14 = vadd.f32 %v2518_v12, %v2517_v11  ;;  %v2423_v10 = vld [vmem:[%s3533_s4] ss:$0 sm:$0xff] }
 0x1c4   : > { %v1634_v15 = vadd.f32 %v2519_v14, %v1593_v9 }
 0x1de   : > { %v2536_v16 = vpop.f32.mrb[8].mxu1 }
 0x1df   : > { %v2537_v17 = vpop.f32.mrb[9].mxu1 }
 0x1e0   : > { %v2538_v18 = vadd.f32 %v2537_v17, %v2536_v16  ;;  %v2539_v19 = vpop.f32.mrb[10].mxu1 }
 0x1e1   : > { %v2540_v20 = vpop.f32.mrb[11].mxu1 }
 0x1e2   : > { %v2541_v21 = vadd.f32 %v2540_v20, %v2539_v19  ;;  %v1672_v22 = vadd.f32 %v2538_v18, %v1631_v13 }
 0x1e4   : > { %v1675_v23 = vadd.f32 %v2541_v21, %v1634_v15  ;;  %v2448_v21 = vld [vmem:[%s3535_s6] ss:$0 sm:$0xff] }
 0x1e6   : > { %v1712_v24 = vpop.f32.mrb[12].mxu1 }
 0x1e7   : > { %v1713_v25 = vadd.f32 %v1712_v24, %v1672_v22  ;;  %v2588_v26 = vpop.f32.mrb[13].mxu1 }
 0x1e8   : > { %v1715_v27 = vpop.f32.mrb[14].mxu1 }
 0x1e9   : > { %v1721_v28 = vmax.f32 %v1713_v25, 0.0  ;;  %v1716_v29 = vadd.f32 %v1715_v27, %v1675_v23  ;;  %v2589_v30 = vpop.f32.mrb[15].mxu1 }
 0x1eb   : > { %v1724_v31 = vmax.f32 %v1716_v29, 0.0 }
 0x1ed   : > { %v1727_v32 = vpack.c.bf16 %v1724_v31, %v1721_v28 }
 0x241   : > { %v1546_v37 = vpop.f32.mrb[0].mxu0 }
 0x242   : > { %v2630_v38 = vadd.f32 %v1546_v37, %v583_v35  ;;  %v1548_v39 = vpop.f32.mrb[1].mxu0 }
 0x243   : > { %v2631_v40 = vadd.f32 %v1548_v39, %v587_v36  ;;  %v1550_v41 = vpop.f32.mrb[2].mxu0 }
 0x244   : > { %v2632_v42 = vadd.f32 %v1550_v41, %v583_v35  ;;  %v1552_v43 = vpop.f32.mrb[3].mxu0  ;;  %v1719_v45 = vmax.f32 %v2630_v38, 0.0 }
 0x245   : > { %v2633_v44 = vadd.f32 %v1552_v43, %v587_v36  ;;  %v1720_v47 = vmax.f32 %v2631_v40, 0.0 }
 0x246   : > { %v1722_v46 = vmax.f32 %v2632_v42, 0.0 }
 0x247   : > { %v1723_v48 = vmax.f32 %v2633_v44, 0.0 }
 0x248   : > { %v1725_v49 = vpack.c.bf16 %v1722_v46, %v1719_v45 }
 0x249   : > { %v1726_v50 = vpack.c.bf16 %v1723_v48, %v1720_v47 }
 0x24b   : > { %1959 = vmatprep.mubr.bf16.mxu1 %v1726_v50 }
 0x24c   : > { %1960 = vmatmul.mubr.bf16.vlgmr.msra.gmra.mrb[16].mxu1 %v1725_v49 }
 0x24d   : > { %2591 = vmatpush3.bf16.msra.mxu1 %v2942_v51  ;;  %2606 = vmatprep.mubr.msk.bf16.mxu1 %vm3157_vm1, %v3156_v4 }
 0x24e   : > { %2592 = vmatprep.subr.bf16.mxu1 %v3156_v4 }
 0x251   : > { %2593 = vmatpush3.bf16.msra.mxu1 %v2943_v52 }
 0x252   : > { %2594 = vmatprep.subr.bf16.mxu1 %v3156_v4 }
 0x255   : > { %2595 = vmatpush3.bf16.msra.mxu1 %v2944_v53 }
 0x256   : > { %2596 = vmatprep.subr.bf16.mxu1 %v3156_v4 }
 0x259   : > { %2597 = vmatpush3.bf16.msra.mxu1 %v2945_v54 }
 0x25a   : > { %2598 = vmatprep.subr.bf16.mxu1 %v3156_v4 }
 0x25d   : > { %2599 = vmatpush3.bf16.msra.mxu1 %v2946_v55 }
 0x25e   : > { %2600 = vmatprep.subr.bf16.mxu1 %v3156_v4 }
 0x261   : > { %2601 = vmatpush3.bf16.msra.mxu1 %v2947_v56 }
 0x262   : > { %2602 = vmatprep.subr.bf16.mxu1 %v3156_v4 }
 0x265   : > { %2603 = vmatpush3.bf16.msra.mxu1 %v2948_v57 }
 0x266   : > { %2604 = vmatprep.subr.bf16.mxu1 %v3156_v4 }
 0x269   : > { %2605 = vmatpush3.bf16.msra.mxu1 %v2949_v58 }
 0x26a   : > { %2610 = vmatprep.subr.bf16.mxu1 %v3156_v4 }
 0x26c   : > { %2607 = vmatmul.mubr.bf16.vlgmr.msra.gmra.mrb[20].mxu1 %v1727_v32 }
 0x26d   : > { %2626 = vmatprep.mubr.msk.bf16.mxu1 %vm3157_vm1, %v3156_v4  ;;  %2611 = vmatpush3.bf16.msra.mxu1 %v2950_v59 }
 0x26e   : > { %2612 = vmatprep.subr.bf16.mxu1 %v3156_v4 }
 0x271   : > { %2613 = vmatpush3.bf16.msra.mxu1 %v2951_v60 }
 0x272   : > { %2614 = vmatprep.subr.bf16.mxu1 %v3156_v4 }
 0x275   : > { %2615 = vmatpush3.bf16.msra.mxu1 %v2952_v61 }
 0x276   : > { %2616 = vmatprep.subr.bf16.mxu1 %v3156_v4 }
 0x279   : > { %2617 = vmatpush3.bf16.msra.mxu1 %v2953_v62 }
 0x27a   : > { %2618 = vmatprep.subr.bf16.mxu1 %v3156_v4 }
 0x27d   : > { %2619 = vmatpush3.bf16.msra.mxu1 %v2954_v63 }
 0x27e   : > { %2620 = vmatprep.subr.bf16.mxu1 %v3156_v4 }
 0x281   : > { %2621 = vmatpush3.bf16.msra.mxu1 %v2955_v0 }
 0x282   : > { %2622 = vmatprep.subr.bf16.mxu1 %v3156_v4 }
 0x285   : > { %2623 = vmatpush3.bf16.msra.mxu1 %v2956_v1 }
 0x286   : > { %2624 = vmatprep.subr.bf16.mxu1 %v3156_v4 }
 0x289   : > { %2625 = vmatpush3.bf16.msra.mxu1 %v2957_v2 }
 0x31f   : > { %v2560_v3 = vpop.f32.mrb[16].mxu1 }
 0x320   : > { %v2561_v5 = vpop.f32.mrb[17].mxu1 }
 0x321   : > { %v2562_v6 = vadd.f32 %v2561_v5, %v2560_v3  ;;  %v2563_v7 = vpop.f32.mrb[18].mxu1 }
 0x322   : > { %v2564_v8 = vpop.f32.mrb[19].mxu1 }
 0x323   : > { %v2565_v9 = vadd.f32 %v2564_v8, %v2563_v7  ;;  %v1962_v11 = vadd.f32 %v2562_v6, %v2423_v10 }
 0x325   : > { %v1965_v15 = vadd.f32 %v2565_v9, %v2423_v10 }
 0x33f   : > { %v2002_v12 = vpop.f32.mrb[20].mxu1 }
 0x340   : > { %v2003_v13 = vadd.f32 %v2002_v12, %v1962_v11  ;;  %v2608_v14 = vpop.f32.mrb[21].mxu1 }
 0x341   : > { %v2005_v16 = vpop.f32.mrb[22].mxu1 }
 0x342   : > { %v2006_v4 = vadd.f32 %v2005_v16, %v1965_v15  ;;  %v2609_v17 = vpop.f32.mrb[23].mxu1  ;;  %v2009_v18 = vmax.f32 %v2003_v13, 0.0 }
 0x344   : > { %v2010_v19 = vmax.f32 %v2006_v4, 0.0 }
 0x346   : > { %v2011_v20 = vpack.c.bf16 %v2010_v19, %v2009_v18 }
 0x348   : > { %2627 = vmatmul.mubr.bf16.vlgmr.msra.gmra.mrb[24].mxu1 %v2011_v20 }
 0x41b   : > { %v2117_v22 = vpop.f32.mrb[24].mxu1 }
 0x41c   : > { %v2628_v23 = vpop.f32.mrb[25].mxu1  ;;  %v2118_v25 = vadd.f32 %v2448_v21, %v2117_v22  ;;  %2141 = sbr.rel (!%p3564_p10) target bundleno = 1087 (0x43f), region = 68 }
 0x41d   : > { %v2120_v24 = vpop.f32.mrb[26].mxu1 }
 0x41e   : > { %v2121_v26 = vadd.f32 %v2448_v21, %v2120_v24  ;;  %v2629_v27 = vpop.f32.mrb[27].mxu1 }
 0x420   : > { %v2474_v28 = vpack.c.bf16 %v2121_v26, %v2118_v25 }
 0x422   : > { %2475 = vst [vmem:[%s348_s1] sm:$0xff] %v2474_v28  }
 0x423   : > { %s3576_s8 = smov (!%p2144_p1, %s2143_s8), 2 }
 0x424   : > { %s3472_s18 = sshll.u32 %s3576_s8, 6 }
 0x425   : > { %s2148_s30 = ssub.s32 128, %s3472_s18 }
 0x426   : > { %2149 = vsyncadd %s2135_s9, %s2148_s30  ;;  %p2462_p4 = scmp.ne.s32.totalorder %s3472_s18, 0  ;;  %s2470_s11 = sshll.u32 %s3223_s28, 7 }
 0x427   : > { %s3482_s17 = scalar_lea.hbm %s3536_s7, %s2470_s11  ;;  %s2154_s20 = sshll.u32 %s348_s1, 4  ;;  %s3484_s20 = int_to_ptr.vmem [resolvable:$true] %s2154_s20 }
 0x428   : > { %s3070_s10 = scalar_lea.vmem %s3484_s20, %s3472_s18  ;;  %s3159_s12 = smov [#allocation10]  }
 0x429   : > { %p3071_p6 = scmp.ne.s32.totalorder %s3484_s20, %s3070_s10  ;;  %s3074_s15 = sshll.u32 %s3159_s12, 4  ;;  %s3075_s15 = int_to_ptr.vmem [resolvable:$false] %s3074_s15 }
 0x42a   : > { %s3076_s28 = scalar_lea.vmem %s3075_s15, 256  ;;  %p3077_p11 = scmp.lt.s32.totalorder %s3484_s20, %s3075_s15 }
 0x42b   : > { %p3072_p3 = pnand %p3071_p6, %p2462_p4  ;;  %p3078_p13 = scmp.lt.s32.totalorder %s3076_s28, %s3070_s10 }
 0x42d   : > { %p3073_p5 = pneg %p3072_p3  ;;  %p3079_p12 = por %p3078_p13, %p3077_p11 }
 0x42f   : > { %p3080_p0 = pnand %p3079_p12, %p3073_p5 }
 0x431   : > { %3083 = shalt.err (!%p3080_p0)
}
 0x432   : > { %s3084_s23 = scalar_lea.hbm %s3482_s17, %s3472_s18  ;;  %s3088_s21 = scalar_lea.hbm %s3536_s7, 320 }
 0x433   : > { %p3085_p2 = scmp.ne.s32.totalorder %s3482_s17, %s3084_s23  ;;  %p3089_p9 = scmp.lt.u32.totalorder %s3482_s17, %s3536_s7 }
 0x434   : > { %p3090_p10 = scmp.lt.u32.totalorder %s3088_s21, %s3084_s23  ;;  %p3092_p6 = scmp.lt.u32.totalorder %s3084_s23, %s3482_s17 }
 0x435   : > { %p3086_p7 = pnand %p3085_p2, %p2462_p4 }
 0x436   : > { %p3091_p1 = por %p3090_p10, %p3089_p9 }
 0x437   : > { %p3087_p8 = pneg %p3086_p7 }
 0x438   : > { %p3093_p3 = por %p3092_p6, %p3091_p1 }
 0x43a   : > { %p3094_p5 = pnand %p3093_p3, %p3087_p8 }
 0x43c   : > { %3097 = shalt.err (!%p3094_p5)
}
 0x43d   : > { %s3160_s22 = smov 64   ;;  %s3161_s8 = smov 4  }
 0x43e   : > { %2160 = dma.vmem_to_hbm [thread:$0]  (%p2462_p4), %s3484_s20, %s3472_s18, %s3482_s17, %s2135_s9, %s3160_s22, %s3160_s22, %s3161_s8  }
 0x43f PF: > { %s3565_s30 = sld [smem:[#allocation15_spill]]  ;;  %s3566_s11 = sld [smem:[#allocation18_spill]] }
 0x440   : > { %p2683_p11 = scmp.ge.s32.totalorder %s3144_s27, 2 }
 0x445   : > { %s2169_s13 = sand.u32 1, %s3565_s30   ;;  %p3567_p13 = scmp.ne.s32.totalorder %s3566_s11, 0 }
 0x446   : > { %s2170_s29 = scalar_lea.sflag [#allocation4], %s2169_s13 }
 0x447   : > { %p2674_p12 = pnand %p2683_p11, %p3567_p13 }
 0x449   : > { %3127 = dma.done.wait (!%p2674_p12), %s2170_s29, 128  }
 0x44a   : > { %3129 = vsyncadd (!%p2674_p12), %s2170_s29, 4294967168  ;;  %s3568_s27 = sld [smem:[#allocation16_spill]]  ;;  %s3569_s10 = sld [smem:[#allocation17_spill]] }
 0x44b   : > { %s3570_s24 = smov %s3136_s25  ;;  %s3571_s25 = smov %s3140_s26 }
 0x450   : > { %p22_p0 = scmp.ge.s32.totalorder %s3568_s27, 5   ;;  %s3572_s26 = smov %s3569_s10 }
 0x452   :  { %24 = sbr.rel (!%p22_p0) target bundleno = 9 (0x9), region = 105 }
 0x459   :  { %2175 = vsyncpa [#allocation3], 1 }
 0x45a   :  { %2177 = vsyncpa [#allocation3 + $0x1], 1 }
 0x45b   :  { %2178 = vsyncpa [#allocation6], 1 }
 0x45c   :  { %2179 = vsyncpa [#allocation9], 1 }
 0x45d   :  { %2180 = vsyncpa [#allocation4], 1 }
 0x45e   :  { %2182 = vsyncpa [#allocation4 + $0x1], 1 }

</bundles_post_ra>
